<compile_context>
chip_gen: v6e
topology: v6e:2x2x1
jax: 0.10.0
libtpu: 0.0.40
codegen_flags: <defaults>
</compile_context>

<pallas_src>
import jax
import jax.numpy as jnp
from jax.experimental import pallas as pl
from jax.experimental.pallas import tpu as pltpu


def _round_up(x, m):
    return ((x + m - 1) // m) * m


def _crop_kernel(x_ref, o_ref):
    # x_ref: (c_blk, in_h, in_w) VMEM tile; o_ref: (c_blk, out_h, w_out) tile.
    # Static upper-left slice; a no-op view when the block shapes already match.
    _, rows, cols = o_ref.shape
    o_ref[...] = x_ref[:, :rows, :cols]


def _vmem_capacity_bytes():
    try:
        info = pltpu.get_tpu_info()
        return int(getattr(info, "vmem_capacity_bytes", 64 * 1024 * 1024))
    except Exception:
        # Conservative fallback = v7x's 64 MiB.
        return 64 * 1024 * 1024


def upper_left_crop(image, size, *, vmem_block_budget_bytes=16 * 1024 * 1024):
    """Pallas implementation of UpperLeftCrop.forward(image, size).

    image: (N, C, H, W) array. size: python float scale factor (static).
    Returns image[..., :int(size*H), :int(size*W)]  (truncation matches int()).
    """
    N, C, H, W = image.shape
    h_out = int(size * H)
    w_out = int(size * W)
    if h_out <= 0 or w_out <= 0:
        raise ValueError(
            "crop size truncates to zero along H or W; a zero-sized output "
            "dimension cannot be emitted by Pallas"
        )

    itemsize = jnp.dtype(image.dtype).itemsize
    # Dtype-aware sublane granularity: 8 rows for 4-byte, 16 for 2-byte,
    # 32 for 1-byte element types (the (8,128) rule scales with packing).
    g = max(8, 32 // itemsize)

    # Crop columns in the BlockSpec: a block width that is a multiple of 128
    # is legal even when smaller than W, so round w_out up to 128 (cap at W).
    in_w = min(_round_up(w_out, 128), W)

    # ---- choose channel / row tiling so 2x(in block + out block) stays
    #      within a per-chip-derived VMEM budget (v5e/v6e/v7x). --------------
    vmem_cap = _vmem_capacity_bytes()
    budget = max(1 << 20, min(vmem_block_budget_bytes, int(0.4 * vmem_cap)))

    bytes_per_chan_row = (in_w + w_out) * itemsize

    rows_full_c = budget // max(1, 2 * C * bytes_per_chan_row)
    if rows_full_c >= g:
        c_tile = C
    else:
        # Even g rows of all channels would not fit: tile the channel axis.
        c_tile = max(1, budget // max(1, 2 * g * bytes_per_chan_row))
    rows_budget = budget // max(1, 2 * c_tile * bytes_per_chan_row)
    h_tile_max = max(g, (rows_budget // g) * g)

    if h_out <= h_tile_max:
        # Whole cropped height fits one block. Output rows == h_out is always
        # legal (full output dim); input rows must be a multiple of g (or the
        # full H) to satisfy the tiling rule.
        out_h = h_out
        if h_out % g == 0 or h_out == H:
            in_h = h_out
        else:
            in_h = min(_round_up(h_out, g), H)
        num_h_blocks = 1
    else:
        # Row-tile the crop; trailing partial block is handled by Pallas edge
        # masking (reads padded, out-of-range writes dropped).
        out_h = in_h = h_tile_max
        num_h_blocks = pl.cdiv(h_out, h_tile_max)

    num_c_blocks = pl.cdiv(C, c_tile)

    # Megacore (v7x, 2 TCs): make sure there are at least 2 grid steps when
    # the crop is large enough to split legally.
    if N * num_c_blocks * num_h_blocks < 2 and h_out >= 2 * g:
        h_tile = _round_up((h_out + 1) // 2, g)
        out_h = in_h = h_tile
        num_h_blocks = pl.cdiv(h_out, h_tile)

    in_block_bytes = c_tile * in_h * in_w * itemsize
    out_block_bytes = c_tile * out_h * w_out * itemsize
    vmem_limit = int(
        min(
            max(16 * 1024 * 1024, vmem_cap - (8 << 20)),
            max(16 * 1024 * 1024,
                2 * (in_block_bytes + out_block_bytes) + (2 << 20)),
        )
    )

    grid = (N, num_c_blocks, num_h_blocks)

    # Pure memory traffic: flops=0 hints XLA to schedule neighbors around it.
    bytes_read = N * C * num_h_blocks * in_h * in_w * itemsize
    bytes_written = N * C * h_out * w_out * itemsize
    cost = pl.CostEstimate(flops=0, transcendentals=0,
                           bytes_accessed=bytes_read + bytes_written)

    return pl.pallas_call(
        _crop_kernel,
        out_shape=jax.ShapeDtypeStruct((N, C, h_out, w_out), image.dtype),
        grid_spec=pltpu.PrefetchScalarGridSpec(
            num_scalar_prefetch=0,
            grid=grid,
            in_specs=[
                pl.BlockSpec(
                    (pl.Squeezed(), c_tile, in_h, in_w),
                    lambda n, c, h: (n, c, h, 0),
                )
            ],
            out_specs=pl.BlockSpec(
                (pl.Squeezed(), c_tile, out_h, w_out),
                lambda n, c, h: (n, c, h, 0),
            ),
        ),
        compiler_params=pltpu.CompilerParams(
            dimension_semantics=("parallel", "parallel", "parallel"),
            vmem_limit_bytes=vmem_limit,
        ),
        cost_estimate=cost,
    )(image)


if __name__ == "__main__":
    key = jax.random.PRNGKey(0)

    # Main check: small NCHW f32 input consistent with the module.
    x = jax.random.normal(key, (2, 4, 16, 16), dtype=jnp.float32)
    size = 0.5  # deterministic crop fraction (random-size branch not used)
    out = jax.block_until_ready(upper_left_crop(x, size))
    h_out, w_out = int(size * 16), int(size * 16)
    ref = x[..., :h_out, :w_out]
    assert out.shape == (2, 4, h_out, w_out), out.shape
    assert jnp.allclose(out, ref), "mismatch vs reference crop (f32, size=0.5)"

    # bf16 path (16-row granularity) with the column crop carried in the
    # BlockSpec (in_w = 128 < W = 256).
    xb = jax.random.normal(key, (1, 3, 32, 256), dtype=jnp.bfloat16)
    outb = jax.block_until_ready(upper_left_crop(xb, 0.5))
    assert outb.shape == (1, 3, 16, 128), outb.shape
    assert jnp.array_equal(outb, xb[..., :16, :128]), "mismatch (bf16)"

    # f32 path where h_out is not a multiple of the sublane granularity
    # (input rows rounded up to 8, output block uses full output dims).
    size2 = 0.3
    out2 = jax.block_until_ready(upper_left_crop(x, size2))
    h2, w2 = int(size2 * 16), int(size2 * 16)
    assert out2.shape == (2, 4, h2, w2), out2.shape
    assert jnp.allclose(out2, x[..., :h2, :w2]), "mismatch (f32, size=0.3)"

    print("KERNEL_OK")
</pallas_src>

<mosaic_0001>
module attributes {stable_mosaic.version = 11 : i64} {
  func.func @_crop_kernel(%arg0: i32, %arg1: i32, %arg2: i32, %arg3: memref<1x4x8x16xf32, #tpu.memory_space<vmem>>, %arg4: memref<1x4x8x8xf32, #tpu.memory_space<vmem>>) attributes {dimension_semantics = [#tpu.dimension_semantics<parallel>, #tpu.dimension_semantics<parallel>, #tpu.dimension_semantics<parallel>], iteration_bounds = array<i64: 2, 1, 1>, scalar_prefetch = 0 : i64, scratch_operands = 0 : i64, tpu.core_type = #tpu.core_type<tc>, window_params = [{transform_indices = @transform_0, window_bounds = array<i64: 1, 4, 8, 16>}, {transform_indices = @transform_1, window_bounds = array<i64: 1, 4, 8, 8>}]} {
    %c0 = arith.constant 0 : index
    %c0_0 = arith.constant 0 : index
    %c0_1 = arith.constant 0 : index
    %c0_2 = arith.constant 0 : index
    %0 = vector.load %arg3[%c0, %c0_0, %c0_1, %c0_2] : memref<1x4x8x16xf32, #tpu.memory_space<vmem>>, vector<1x4x8x8xf32>
    %1 = vector.shape_cast %0 : vector<1x4x8x8xf32> to vector<4x8x8xf32>
    %c0_3 = arith.constant 0 : index
    %c0_4 = arith.constant 0 : index
    %c0_5 = arith.constant 0 : index
    %c0_6 = arith.constant 0 : index
    %2 = vector.load %arg4[%c0_3, %c0_4, %c0_5, %c0_6] : memref<1x4x8x8xf32, #tpu.memory_space<vmem>>, vector<1x4x8x8xf32>
    %3 = vector.shape_cast %2 : vector<1x4x8x8xf32> to vector<4x8x8xf32>
    %4 = vector.shape_cast %1 : vector<4x8x8xf32> to vector<1x4x8x8xf32>
    tpu.vector_store %arg4[%c0_3, %c0_4, %c0_5, %c0_6], %4 {strides = array<i32>} : memref<1x4x8x8xf32, #tpu.memory_space<vmem>>, vector<1x4x8x8xf32>,
    return
  }
  func.func @transform_0(%arg0: i32, %arg1: i32, %arg2: i32) -> (i32, i32, i32, i32) {
    %c0_i32 = arith.constant 0 : i32
    %c0_i32_0 = arith.constant 0 : i32
    return %arg0, %arg1, %arg2, %c0_i32 : i32, i32, i32, i32
  }
  func.func @transform_1(%arg0: i32, %arg1: i32, %arg2: i32) -> (i32, i32, i32, i32) {
    %c0_i32 = arith.constant 0 : i32
    %c0_i32_0 = arith.constant 0 : i32
    return %arg0, %arg1, %arg2, %c0_i32 : i32, i32, i32, i32
  }
}

</mosaic_0001>

<bundles_post_ra>
// kernel: tpu_custom_call.1
= control target key start
LH: loop header
LB: loop body
LE: loop exit
PB: predicated region body
PF: predicated region fallthrough
CT: control target
= control target key end

     0   :  { %6 = vsyncpa [#allocation3], 0  ;;  %s641_s0 = inlined_call_operand.hbm [shape: f32[2,4,16,16], index: 0, kind: input, shape index: {}]   ;;  %s642_s1 = inlined_call_operand.hbm [shape: f32[2,4,8,8], index: 1, kind: output, shape index: {}]  }
   0x1   :  { %8 = vsyncpa [#allocation3 + $0x1], 0 }
   0x2   :  { %9 = vsyncpa [#allocation4], 0 }
   0x3   :  { %11 = vsyncpa [#allocation4 + $0x1], 0  ;;  %s497_s6 = smov 0   ;;  %s499_s7 = smov 0  }
   0x4   :  { %s501_s8 = smov 0   ;;  %s503_s9 = smov 0  }
   0x5   :  { %s505_s10 = smov 0   ;;  %s507_s11 = smov 0  }
   0x6 LB: > { %s286_s12 = sadd.s32 4294967295, %s478_s11   ;;  %s287_s13 = sadd.s32 4294967294, %s478_s11   ;;  %s478_s11 = sphi %s507_s11, %s17_s11   ;;  %s474_s10 = sphi %s505_s10, %s653_s10   ;;  %s470_s9 = sphi %s503_s9, %s652_s9   ;;  %s466_s8 = sphi %s501_s8, %s651_s8   ;;  %s462_s7 = sphi %s499_s7, %s650_s7   ;;  %s458_s6 = sphi %s497_s6, %s649_s6  }
   0x7   : > { %s36_s14 = sadd.s32 1, %s474_s10  ;;  %s47_s15 = sadd.s32 1, %s466_s8 }
   0x8   : > { %p38_p0 = scmp.ge.s32.totalorder %s36_s14, 2  ;;  %p54_p1 = scmp.ne.s32.totalorder %s466_s8, %s462_s7 }
   0x9   : > { %p55_p2 = scmp.eq.s32.totalorder %s478_s11, 0  ;;  %p60_p3 = scmp.ne.s32.totalorder %s462_s7, %s458_s6 }
   0xa   : > { %s655_s14 = smov (%p38_p0, %s36_s14), 0  ;;  %p61_p5 = scmp.eq.s32.totalorder %s286_s12, 0 }
   0xb   : > { %p538_p4 = por %p55_p2, %p54_p1  ;;  %s40_s17 = ssub.s32 %s474_s10, %s655_s14 }
   0xc   : > { %p88_p6 = scmp.eq.s32.totalorder %s286_s12, 1  ;;  %p45_p7 = scmp.eq.s32.totalorder %s40_s17, 0 }
   0xd   : > { %p544_p8 = por %p61_p5, %p60_p3  ;;  %p94_p10 = scmp.eq.s32.totalorder %s287_s13, 1 }
   0xe   : > { %p548_p9 = por %p88_p6, %p54_p1  ;;  %p315_p13 = scmp.lt.s32.totalorder %s478_s11, 2 }
   0xf   : > { %s553_s20 = scalar_select %p45_p7, %s466_s8, %s47_s15  }
  0x10   : > { %p555_p11 = por %p94_p10, %p60_p3  ;;  %s114_s22 = sand.u32 1, %s466_s8  }
  0x11   : > { %s290_s23 = sshll.u32 %s114_s22, 5  ;;  %s301_s24 = sshll.u32 %s474_s10, 10 }
  0x12   : > { %s128_s27 = scalar_lea.hbm %s641_s0, %s301_s24  ;;  %s118_s28 = scalar_lea.vmem [#allocation2], %s290_s23 }
  0x13   : > { %s129_s29 = sshll.u32 %s118_s28, 4  ;;  %p568_p0 = pnand %p315_p13, %p538_p4  ;;  %s130_s29 = int_to_ptr.vmem [resolvable:$true] %s129_s29 }
  0x14   : > { %s115_s2 = scalar_lea.sflag [#allocation3], %s114_s22  ;;  %s383_s3 = scalar_lea.vmem %s130_s29, 512 }
  0x15   : > { %p372_p1 = pneg %p568_p0  ;;  %p384_p2 = scmp.ne.s32.totalorder %s130_s29, %s383_s3 }
  0x16   : > { %s480_s4 = smov [#allocation2]  }
  0x17   : > { %p386_p3 = pnand %p384_p2, %p372_p1  ;;  %s388_s5 = sshll.u32 %s480_s4, 4  ;;  %s389_s5 = int_to_ptr.vmem [resolvable:$false] %s388_s5 }
  0x18   : > { %s390_s12 = scalar_lea.vmem %s389_s5, 1024  ;;  %p391_p6 = scmp.lt.s32.totalorder %s130_s29, %s389_s5 }
  0x19   : > { %p387_p5 = pneg %p386_p3  ;;  %p392_p7 = scmp.lt.s32.totalorder %s390_s12, %s383_s3 }
  0x1b   : > { %p393_p10 = por %p392_p7, %p391_p6 }
  0x1d   : > { %p394_p12 = pnand %p393_p10, %p387_p5 }
  0x1f   : > { %397 = shalt.err (!%p394_p12)
}
  0x20   : > { %s481_s13 = smov 256   ;;  %s482_s15 = smov 128  }
  0x21   : > { %s483_s16 = smov 8   ;;  %p293_p4 = scmp.ge.s32.totalorder %s478_s11, 1 }
  0x22   : > { %310 = dma.hbm_to_vmem [thread:$0]  (!%p568_p0), %s128_s27, 512, %s130_s29, %s115_s2, %s481_s13, %s482_s15, %s483_s16  }
  0x23   : > { %p137_p13 = scmp.lt.s32.totalorder %s478_s11, 3 }
  0x25   : > { %p138_p1 = pnand %p293_p4, %p137_p13 }
  0x26   : > { %s579_s17 = sand.u32 (!%p138_p1), 1, %s462_s7  }
  0x27   : > { %141 = sbr.rel (%p138_p1) target bundleno = 70 (0x46), region = 24  ;;  %s294_s22 = sshll.u32 (!%p138_p1), %s579_s17, 5 }
  0x28   : > { %s144_s23 = scalar_lea.sflag (!%p138_p1), [#allocation3], %s579_s17  ;;  %s147_s24 = scalar_lea.vmem (!%p138_p1), [#allocation2], %s294_s22 }
  0x2c   : > { %449 = dma.done.wait (%p544_p8), %s144_s23, 512  }
  0x2d   : > { %451 = vsyncadd (%p544_p8), %s144_s23, 4294966784  ;;  %s165_s25 = scalar_lea.vmem [#allocation5], %s294_s22  ;;  %s302_s27 = sshll.u32 %s470_s9, 9  ;;  %vm172_vm0 = vcmask 64512   ;;  %v168_v0 = vld [vmem:[%s147_s24] sm:$0xff]  ;;  %v169_v1 = vld [vmem:[%s147_s24 + $0x8] sm:$0xff] }
  0x2e   : > { %s194_s26 = sshll.u32 %s165_s25, 4  ;;  %s593_s30 = scalar_lea.hbm %s642_s1, %s302_s27  ;;  %v170_v2 = vld [vmem:[%s147_s24 + $0x10] sm:$0xff]  ;;  %173 = vst.msk [vmem:[%s165_s25] sm:$0xff] %vm172_vm0, %v168_v0  ;;  %174 = vst.msk [vmem:[%s165_s25 + $0x8] sm:$0xff] %vm172_vm0, %v169_v1  ;;  %v171_v3 = vld [vmem:[%s147_s24 + $0x18] sm:$0xff]  ;;  %s588_s26 = int_to_ptr.vmem [resolvable:$true] %s194_s26 }
  0x2f   : > { %175 = vst.msk [vmem:[%s165_s25 + $0x10] sm:$0xff] %vm172_vm0, %v170_v2  ;;  %176 = vst.msk [vmem:[%s165_s25 + $0x18] sm:$0xff] %vm172_vm0, %v171_v3  ;;  %s178_s9 = scalar_lea.sflag [#allocation4], %s579_s17  ;;  %s398_s18 = scalar_lea.vmem %s588_s26, 512 }
  0x30   : > { %p399_p8 = scmp.ne.s32.totalorder %s588_s26, %s398_s18  ;;  %s484_s2 = smov [#allocation5]  }
  0x31   : > { %s402_s3 = sshll.u32 %s484_s2, 4  ;;  %s403_s3 = int_to_ptr.vmem [resolvable:$false] %s402_s3 }
  0x32   : > { %p400_p12 = pnand %p399_p8, %p548_p9  ;;  %s404_s4 = scalar_lea.vmem %s403_s3, 1024 }
  0x33   : > { %p405_p2 = scmp.lt.s32.totalorder %s588_s26, %s403_s3  ;;  %p406_p3 = scmp.lt.s32.totalorder %s404_s4, %s398_s18 }
  0x34   : > { %p401_p0 = pneg %p400_p12 }
  0x35   : > { %p407_p5 = por %p406_p3, %p405_p2 }
  0x37   : > { %p408_p6 = pnand %p407_p5, %p401_p0 }
  0x39   : > { %411 = shalt.err (!%p408_p6)
}
  0x3a   : > { %s412_s5 = scalar_lea.hbm %s593_s30, 512  ;;  %s416_s15 = scalar_lea.hbm %s642_s1, 1024 }
  0x3b   : > { %p413_p7 = scmp.ne.s32.totalorder %s593_s30, %s412_s5  ;;  %p417_p13 = scmp.lt.s32.totalorder %s593_s30, %s642_s1 }
  0x3c   : > { %p418_p1 = scmp.lt.s32.totalorder %s416_s15, %s412_s5 }
  0x3d   : > { %p414_p10 = pnand %p413_p7, %p548_p9 }
  0x3e   : > { %p419_p8 = por %p418_p1, %p417_p13 }
  0x3f   : > { %p415_p4 = pneg %p414_p10 }
  0x41   : > { %p420_p12 = pnand %p419_p8, %p415_p4 }
  0x43   : > { %423 = shalt.err (!%p420_p12)
}
  0x44   : > { %s485_s23 = smov 128   ;;  %s486_s24 = smov 8  }
  0x45   : > { %305 = dma.vmem_to_hbm [thread:$0]  (%p548_p9), %s588_s26, 512, %s593_s30, %s178_s9, %s485_s23, %s485_s23, %s486_s24  }
  0x46 PF: > { %s209_s25 = sand.u32 1, %s458_s6   ;;  %p648_p0 = scmp.ge.s32.totalorder %s478_s11, 2 }
  0x47   : > { %s210_s27 = scalar_lea.sflag [#allocation4], %s209_s25 }
  0x48   : > { %p312_p2 = pnand %p648_p0, %p555_p11 }
  0x4a   : > { %p313_p3 = pneg %p312_p2 }
  0x4c   : > { %453 = dma.done.wait (%p313_p3), %s210_s27, 512  }
  0x4d   : > { %455 = vsyncadd (%p313_p3), %s210_s27, 4294966784  ;;  %s17_s11 = sadd.s32 1, %s478_s11   ;;  %s649_s6 = smov %s462_s7 }
  0x4e   : > { %p14_p5 = scmp.ge.s32.totalorder %s17_s11, 4   ;;  %s650_s7 = smov %s466_s8 }
  0x4f   : > { %s651_s8 = smov %s553_s20  ;;  %s652_s9 = smov %s474_s10 }
  0x50   : > { %s653_s10 = smov %s655_s14  ;;  %16 = sbr.rel (!%p14_p5) target bundleno = 6 (0x6), region = 69 }
  0x55   :  { %215 = vsyncpa [#allocation3], 1 }
  0x56   :  { %217 = vsyncpa [#allocation3 + $0x1], 1 }
  0x57   :  { %218 = vsyncpa [#allocation4], 1 }
  0x58   :  { %220 = vsyncpa [#allocation4 + $0x1], 1 }

</bundles_post_ra>
